<compile_context>
chip_gen: v7x
topology: tpu7x:2x2x1
jax: 0.10.0
libtpu: 0.0.40
codegen_flags: <defaults>
</compile_context>

<pallas_src>
import functools

import jax
import jax.numpy as jnp
from jax.experimental import pallas as pl
from jax.experimental.pallas import tpu as pltpu


def _dice_kernel(scalars_ref, logits_ref, labels_ref, part_ref,
                 acc_inter, acc_tgt, *, num_classes, ignore_index, tile_hw,
                 hw, mask_tail):
    i = pl.program_id(1)

    @pl.when(i == 0)
    def _():
        acc_inter[...] = jnp.zeros_like(acc_inter)
        acc_tgt[...] = jnp.zeros_like(acc_tgt)

    x = logits_ref[...].astype(jnp.float32)                 # (C, T)
    labels = labels_ref[...]                                # (1, T) int32

    # Fused ignore_index remap (scalars live in SMEM via scalar prefetch).
    do_replace = scalars_ref[0]
    tmin = scalars_ref[1]
    labels = jnp.where(
        jnp.logical_and(do_replace == 1, labels == ignore_index), tmin, labels)

    # Unnormalized softmax pieces only; never materialize sm = e / denom.
    m = jnp.max(x, axis=0, keepdims=True)                   # (1, T) sublane reduce
    e = jnp.exp(x - m)                                      # (C, T) EUP
    denom = jnp.sum(e, axis=0, keepdims=True)               # (1, T) sublane reduce

    # EUP approx reciprocal + one Newton step -> ~f32 accuracy at VPU cost of
    # two tiny (1, T) ops.
    r = pl.reciprocal(denom, approx=True)
    r = r * (2.0 - denom * r)

    # Gather e at the label channel with a select + channel reduce (XLU has
    # slack; only the softmax max/sum use it).  iota regenerates per step but
    # is a cheap VPU fill; hoisting it would cost a (C, T) VMEM scratch.
    ch = jax.lax.broadcasted_iota(jnp.int32, x.shape, 0)    # (C, T)
    e_lbl = jnp.sum(jnp.where(ch == labels, e, 0.0), axis=0, keepdims=True)

    inter_c = e_lbl * r                                     # (1, T)
    tgt_c = jnp.logical_and(labels >= 0,
                            labels < num_classes).astype(jnp.float32)

    if mask_tail:
        # Last block may read past the end of the pixel row (unspecified
        # values); mask those lanes out of both accumulators.
        lane = jax.lax.broadcasted_iota(jnp.int32, (1, tile_hw), 1)
        valid = (i * tile_hw + lane) < hw
        inter_c = jnp.where(valid, inter_c, 0.0)
        tgt_c = jnp.where(valid, tgt_c, 0.0)

    # Hot loop writes only two (1, T) accumulators -> minimal vst pressure.
    acc_inter[...] += inter_c
    acc_tgt[...] += tgt_c

    @pl.when(i == pl.num_programs(1) - 1)
    def _():
        inter = jnp.sum(acc_inter[...])
        tgt = jnp.sum(acc_tgt[...])
        row = jax.lax.broadcasted_iota(jnp.int32, part_ref.shape, 0)
        # row 0 -> intersection partial, row 1 -> valid-label count partial
        part_ref[...] = jnp.where(row == 0, inter, tgt)


def _pick_tile_hw(hw, num_classes, in_itemsize, vmem_budget_bytes, cap=32768):
    """Largest lane-dense tile (multiple of 128) that fits the VMEM budget."""
    # Per-lane bytes: double-buffered logits block, double-buffered labels,
    # ~4 live (C, T) f32 intermediates (x / e / select / iota), plus the
    # (1, T) accumulators and denominators.
    bytes_per_lane = 2 * num_classes * in_itemsize + 8 + 4 * num_classes * 4 + 24
    t = min(int(vmem_budget_bytes) // bytes_per_lane, cap)
    t = max(128, (t // 128) * 128)
    hw128 = ((hw + 127) // 128) * 128
    return int(min(t, hw128))


def dice_loss(output, target, smooth=1.0, ignore_index=255,
              tile_hw=None, vmem_limit_bytes=48 * 1024 * 1024):
    """output: (N, C, H, W) float logits (f32 or bf16); target: (N, H, W) ints."""
    N, C, H, W = output.shape
    HW = H * W

    # --- ignore_index handling: only the two scalars are computed here (one
    # fused reduction pass); the actual label remap happens in-kernel, so no
    # rewritten labels array is materialized in HBM.
    target = target.astype(jnp.int32)
    tmin = jnp.min(target)
    tmax = jnp.max(target)
    # Python `ignore_index not in range(min, max)`  ==  not (min <= ii < max)
    not_in_range = jnp.logical_not(
        jnp.logical_and(ignore_index >= tmin, ignore_index < tmax))
    has_ignore = jnp.any(target == ignore_index)
    do_replace = jnp.logical_and(not_in_range, has_ignore)
    scalars = jnp.stack([do_replace.astype(jnp.int32), tmin])   # (2,) int32 SMEM

    # --- layout: contiguous (free) reshapes only, NO transpose ---
    logits = output.reshape(N, C, HW)
    labels = target.reshape(N, 1, HW)

    if tile_hw is None:
        tile_hw = _pick_tile_hw(HW, C, output.dtype.itemsize,
                                (vmem_limit_bytes * 3) // 4)
    num_tiles = -(-HW // tile_hw)                 # ceil-divide; partial tail ok
    mask_tail = (HW % tile_hw) != 0

    kernel = functools.partial(
        _dice_kernel, num_classes=C, ignore_index=int(ignore_index),
        tile_hw=tile_hw, hw=HW, mask_tail=mask_tail)

    partials = pl.pallas_call(
        kernel,
        # Per-batch partial sums: [n, 0, 0] = intersection, [n, 1, 0] = valid
        # label count.  Lane-padded to 128 so the block is layout-friendly.
        out_shape=jax.ShapeDtypeStruct((N, 2, 128), jnp.float32),
        grid_spec=pltpu.PrefetchScalarGridSpec(
            num_scalar_prefetch=1,
            grid=(N, num_tiles),
            in_specs=[
                # N squeezed out of the block; kernel sees (C, tile_hw)
                pl.BlockSpec((None, C, tile_hw), lambda n, i, s: (n, 0, i)),
                pl.BlockSpec((None, 1, tile_hw), lambda n, i, s: (n, 0, i)),
            ],
            out_specs=pl.BlockSpec((None, 2, 128), lambda n, i, s: (n, 0, 0)),
            scratch_shapes=[
                pltpu.VMEM((1, tile_hw), jnp.float32),   # acc_inter
                pltpu.VMEM((1, tile_hw), jnp.float32),   # acc_tgt
            ],
        ),
        compiler_params=pltpu.CompilerParams(
            # Batch axis is safe to shard across v7x's two TensorCores: each
            # batch element has its own output row and scratch init/epilogue
            # are gated on the pixel-tile axis only.
            dimension_semantics=("parallel", "arbitrary"),
            vmem_limit_bytes=int(vmem_limit_bytes)),
    )(scalars, logits, labels)

    inter = jnp.sum(partials[:, 0, 0])
    tgt = jnp.sum(partials[:, 1, 0])
    # sum(softmax) over channels is exactly 1 per pixel -> analytic pixel count.
    out_sum = jnp.float32(N * HW)
    return 1.0 - (2.0 * inter + smooth) / (out_sum + tgt + smooth)


def _dice_loss_ref(output, target, smooth=1.0, ignore_index=255):
    """Pure-JAX reference mirroring the PyTorch forward."""
    target = target.astype(jnp.int32)
    tmin = jnp.min(target)
    tmax = jnp.max(target)
    not_in_range = jnp.logical_not((ignore_index >= tmin) & (ignore_index < tmax))
    has_ignore = jnp.sum(target == ignore_index) > 0
    do_replace = jnp.logical_and(not_in_range, has_ignore)
    target = jnp.where(do_replace & (target == ignore_index), tmin, target)

    C = output.shape[1]
    one_hot = jax.nn.one_hot(target, C, axis=1, dtype=jnp.float32)  # (N,C,H,W)
    sm = jax.nn.softmax(output.astype(jnp.float32), axis=1)
    inter = jnp.sum(sm * one_hot)
    return 1.0 - (2.0 * inter + smooth) / (jnp.sum(sm) + jnp.sum(one_hot) + smooth)


if __name__ == "__main__":
    key = jax.random.PRNGKey(0)
    k1, k2, k3, k4, k5 = jax.random.split(key, 5)

    # Test 1: lane-aligned shape, no ignore pixels (matches the module's
    # typical use; exercises the clean divisible-tile path).
    N, C, H, W = 2, 4, 16, 16
    logits = jax.random.normal(k1, (N, C, H, W), dtype=jnp.float32)
    labels = jax.random.randint(k2, (N, H, W), 0, C, dtype=jnp.int32)

    loss = dice_loss(logits, labels, smooth=1.0, ignore_index=255)
    loss = jax.block_until_ready(loss)
    ref = _dice_loss_ref(logits, labels, smooth=1.0, ignore_index=255)
    assert jnp.allclose(loss, ref, atol=1e-5, rtol=1e-5), (loss, ref)

    # Test 2: odd spatial size (tail-masked partial block) + ignore_index
    # pixels (exercises the fused SMEM remap path).
    N2, C2, H2, W2 = 2, 5, 9, 13
    logits2 = jax.random.normal(k3, (N2, C2, H2, W2), dtype=jnp.float32)
    labels2 = jax.random.randint(k4, (N2, H2, W2), 0, C2, dtype=jnp.int32)
    ignore_mask = jax.random.uniform(k5, (N2, H2, W2)) < 0.1
    labels2 = jnp.where(ignore_mask, 255, labels2)

    loss2 = dice_loss(logits2, labels2, smooth=1.0, ignore_index=255)
    loss2 = jax.block_until_ready(loss2)
    ref2 = _dice_loss_ref(logits2, labels2, smooth=1.0, ignore_index=255)
    assert jnp.allclose(loss2, ref2, atol=1e-5, rtol=1e-5), (loss2, ref2)

    print("KERNEL_OK")
</pallas_src>

<mosaic_0001>
module attributes {stable_mosaic.version = 11 : i64} {
  func.func @_dice_kernel(%arg0: i32, %arg1: i32, %arg2: memref<2xi32, #tpu.memory_space<smem>>, %arg3: memref<1x4x256xf32, #tpu.memory_space<vmem>>, %arg4: memref<1x1x256xi32, #tpu.memory_space<vmem>>, %arg5: memref<1x2x128xf32, #tpu.memory_space<vmem>>, %arg6: memref<1x256xf32, #tpu.memory_space<vmem>>, %arg7: memref<1x256xf32, #tpu.memory_space<vmem>>) attributes {dimension_semantics = [#tpu.dimension_semantics<parallel>, #tpu.dimension_semantics<arbitrary>], iteration_bounds = array<i64: 2, 1>, scalar_prefetch = 1 : i64, scratch_operands = 2 : i64, tpu.core_type = #tpu.core_type<tc>, window_params = [{transform_indices = @transform_0, window_bounds = array<i64: 1, 4, 256>}, {transform_indices = @transform_1, window_bounds = array<i64: 1, 1, 256>}, {transform_indices = @transform_2, window_bounds = array<i64: 1, 2, 128>}]} {
    %c0_i32 = arith.constant 0 : i32
    %0 = arith.cmpi eq, %arg1, %c0_i32 : i32
    %1 = arith.extui %0 : i1 to i32
    %c0_i32_0 = arith.constant 0 : i32
    %2 = arith.cmpi ne, %1, %c0_i32_0 : i32
    scf.if %2 {
      %cst_22 = arith.constant 0.000000e+00 : f32
      %52 = vector.broadcast %cst_22 : f32 to vector<1x256xf32>
      %c0_23 = arith.constant 0 : index
      %c0_24 = arith.constant 0 : index
      %53 = vector.load %arg6[%c0_23, %c0_24] : memref<1x256xf32, #tpu.memory_space<vmem>>, vector<1x256xf32>
      tpu.vector_store %arg6[%c0_23, %c0_24], %52 {strides = array<i32>} : memref<1x256xf32, #tpu.memory_space<vmem>>, vector<1x256xf32>,
      %cst_25 = arith.constant 0.000000e+00 : f32
      %54 = vector.broadcast %cst_25 : f32 to vector<1x256xf32>
      %c0_26 = arith.constant 0 : index
      %c0_27 = arith.constant 0 : index
      %55 = vector.load %arg7[%c0_26, %c0_27] : memref<1x256xf32, #tpu.memory_space<vmem>>, vector<1x256xf32>
      tpu.vector_store %arg7[%c0_26, %c0_27], %54 {strides = array<i32>} : memref<1x256xf32, #tpu.memory_space<vmem>>, vector<1x256xf32>,
    } else {
    }
    %c0 = arith.constant 0 : index
    %c0_1 = arith.constant 0 : index
    %c0_2 = arith.constant 0 : index
    %3 = vector.load %arg3[%c0, %c0_1, %c0_2] : memref<1x4x256xf32, #tpu.memory_space<vmem>>, vector<1x4x256xf32>
    %4 = vector.shape_cast %3 : vector<1x4x256xf32> to vector<4x256xf32>
    %c0_3 = arith.constant 0 : index
    %c0_4 = arith.constant 0 : index
    %c0_5 = arith.constant 0 : index
    %5 = vector.load %arg4[%c0_3, %c0_4, %c0_5] : memref<1x1x256xi32, #tpu.memory_space<vmem>>, vector<1x1x256xi32>
    %6 = vector.shape_cast %5 : vector<1x1x256xi32> to vector<1x256xi32>
    %c0_6 = arith.constant 0 : index
    %7 = memref.load %arg2[%c0_6] : memref<2xi32, #tpu.memory_space<smem>>
    %c1 = arith.constant 1 : index
    %8 = memref.load %arg2[%c1] : memref<2xi32, #tpu.memory_space<smem>>
    %c1_i32 = arith.constant 1 : i32
    %9 = arith.cmpi eq, %7, %c1_i32 : i32
    %c255_i32 = arith.constant 255 : i32
    %10 = vector.broadcast %c255_i32 : i32 to vector<1x256xi32>
    %11 = arith.cmpi eq, %6, %10 : vector<1x256xi32>
    %12 = vector.broadcast %9 : i1 to vector<1x256xi1>
    %13 = arith.andi %12, %11 : vector<1x256xi1>
    %14 = vector.broadcast %8 : i32 to vector<1x256xi32>
    %15 = arith.select %13, %14, %6 : vector<1x256xi1>, vector<1x256xi32>
    %cst = arith.constant dense<0xFF800000> : vector<256xf32>
    %16 = vector.multi_reduction <maximumf>, %4, %cst [0] : vector<4x256xf32> to vector<256xf32>
    %17 = vector.shape_cast %16 : vector<256xf32> to vector<1x256xf32>
    %18 = vector.broadcast %17 : vector<1x256xf32> to vector<4x256xf32>
    %19 = arith.subf %4, %18 : vector<4x256xf32>
    %20 = math.exp %19 : vector<4x256xf32>
    %cst_7 = arith.constant dense<0.000000e+00> : vector<256xf32>
    %21 = vector.multi_reduction <add>, %20, %cst_7 [0] : vector<4x256xf32> to vector<256xf32>
    %22 = vector.shape_cast %21 : vector<256xf32> to vector<1x256xf32>
    %23 = tpu.reciprocal %22 {approx = true} : vector<1x256xf32> -> vector<1x256xf32>
    %24 = arith.mulf %22, %23 : vector<1x256xf32>
    %cst_8 = arith.constant 2.000000e+00 : f32
    %25 = vector.broadcast %cst_8 : f32 to vector<1x256xf32>
    %26 = arith.subf %25, %24 : vector<1x256xf32>
    %27 = arith.mulf %23, %26 : vector<1x256xf32>
    %28 = tpu.iota {dimensions = array<i32: 0>} : vector<4x256xi32>
    %29 = vector.broadcast %15 : vector<1x256xi32> to vector<4x256xi32>
    %30 = arith.cmpi eq, %28, %29 : vector<4x256xi32>
    %cst_9 = arith.constant 0.000000e+00 : f32
    %31 = vector.broadcast %cst_9 : f32 to vector<4x256xf32>
    %32 = arith.select %30, %20, %31 : vector<4x256xi1>, vector<4x256xf32>
    %cst_10 = arith.constant dense<0.000000e+00> : vector<256xf32>
    %33 = vector.multi_reduction <add>, %32, %cst_10 [0] : vector<4x256xf32> to vector<256xf32>
    %34 = vector.shape_cast %33 : vector<256xf32> to vector<1x256xf32>
    %35 = arith.mulf %34, %27 : vector<1x256xf32>
    %c0_i32_11 = arith.constant 0 : i32
    %36 = vector.broadcast %c0_i32_11 : i32 to vector<1x256xi32>
    %37 = arith.cmpi sge, %15, %36 : vector<1x256xi32>
    %c4_i32 = arith.constant 4 : i32
    %38 = vector.broadcast %c4_i32 : i32 to vector<1x256xi32>
    %39 = arith.cmpi slt, %15, %38 : vector<1x256xi32>
    %40 = arith.andi %37, %39 : vector<1x256xi1>
    %41 = arith.extui %40 : vector<1x256xi1> to vector<1x256xi32>
    %42 = arith.sitofp %41 : vector<1x256xi32> to vector<1x256xf32>
    %c0_12 = arith.constant 0 : index
    %c0_13 = arith.constant 0 : index
    %43 = vector.load %arg6[%c0_12, %c0_13] : memref<1x256xf32, #tpu.memory_space<vmem>>, vector<1x256xf32>
    %44 = arith.addf %43, %35 : vector<1x256xf32>
    %c0_14 = arith.constant 0 : index
    %c0_15 = arith.constant 0 : index
    %45 = vector.load %arg6[%c0_14, %c0_15] : memref<1x256xf32, #tpu.memory_space<vmem>>, vector<1x256xf32>
    tpu.vector_store %arg6[%c0_14, %c0_15], %44 {strides = array<i32>} : memref<1x256xf32, #tpu.memory_space<vmem>>, vector<1x256xf32>,
    %c0_16 = arith.constant 0 : index
    %c0_17 = arith.constant 0 : index
    %46 = vector.load %arg7[%c0_16, %c0_17] : memref<1x256xf32, #tpu.memory_space<vmem>>, vector<1x256xf32>
    %47 = arith.addf %46, %42 : vector<1x256xf32>
    %c0_18 = arith.constant 0 : index
    %c0_19 = arith.constant 0 : index
    %48 = vector.load %arg7[%c0_18, %c0_19] : memref<1x256xf32, #tpu.memory_space<vmem>>, vector<1x256xf32>
    tpu.vector_store %arg7[%c0_18, %c0_19], %47 {strides = array<i32>} : memref<1x256xf32, #tpu.memory_space<vmem>>, vector<1x256xf32>,
    %c0_i32_20 = arith.constant 0 : i32
    %49 = arith.cmpi eq, %arg1, %c0_i32_20 : i32
    %50 = arith.extui %49 : i1 to i32
    %c0_i32_21 = arith.constant 0 : i32
    %51 = arith.cmpi ne, %50, %c0_i32_21 : i32
    scf.if %51 {
      %c0_22 = arith.constant 0 : index
      %c0_23 = arith.constant 0 : index
      %52 = vector.load %arg6[%c0_22, %c0_23] : memref<1x256xf32, #tpu.memory_space<vmem>>, vector<1x256xf32>
      %53 = vector.shape_cast %52 : vector<1x256xf32> to vector<1x1x256xf32>
      %cst_24 = arith.constant dense<0.000000e+00> : vector<1xf32>
      %54 = vector.multi_reduction <add>, %53, %cst_24 [1, 2] : vector<1x1x256xf32> to vector<1xf32>
      %55 = vector.shape_cast %54 : vector<1xf32> to vector<1x1x1xf32>
      %56 = vector.extract %55[0, 0, 0] : f32 from vector<1x1x1xf32>
      %c0_25 = arith.constant 0 : index
      %c0_26 = arith.constant 0 : index
      %57 = vector.load %arg7[%c0_25, %c0_26] : memref<1x256xf32, #tpu.memory_space<vmem>>, vector<1x256xf32>
      %58 = vector.shape_cast %57 : vector<1x256xf32> to vector<1x1x256xf32>
      %cst_27 = arith.constant dense<0.000000e+00> : vector<1xf32>
      %59 = vector.multi_reduction <add>, %58, %cst_27 [1, 2] : vector<1x1x256xf32> to vector<1xf32>
      %60 = vector.shape_cast %59 : vector<1xf32> to vector<1x1x1xf32>
      %61 = vector.extract %60[0, 0, 0] : f32 from vector<1x1x1xf32>
      %62 = tpu.iota {dimensions = array<i32: 0>} : vector<2x128xi32>
      %c0_i32_28 = arith.constant 0 : i32
      %63 = vector.broadcast %c0_i32_28 : i32 to vector<2x128xi32>
      %64 = arith.cmpi eq, %62, %63 : vector<2x128xi32>
      %65 = vector.broadcast %56 : f32 to vector<2x128xf32>
      %66 = vector.broadcast %61 : f32 to vector<2x128xf32>
      %67 = arith.select %64, %65, %66 : vector<2x128xi1>, vector<2x128xf32>
      %c0_29 = arith.constant 0 : index
      %c0_30 = arith.constant 0 : index
      %c0_31 = arith.constant 0 : index
      %68 = vector.load %arg5[%c0_29, %c0_30, %c0_31] : memref<1x2x128xf32, #tpu.memory_space<vmem>>, vector<1x2x128xf32>
      %69 = vector.shape_cast %68 : vector<1x2x128xf32> to vector<2x128xf32>
      %70 = vector.shape_cast %67 : vector<2x128xf32> to vector<1x2x128xf32>
      tpu.vector_store %arg5[%c0_29, %c0_30, %c0_31], %70 {strides = array<i32>} : memref<1x2x128xf32, #tpu.memory_space<vmem>>, vector<1x2x128xf32>,
    } else {
    }
    return
  }
  func.func @transform_0(%arg0: i32, %arg1: i32, %arg2: memref<2xi32, #tpu.memory_space<smem>>) -> (i32, i32, i32) {
    %c0_i32 = arith.constant 0 : i32
    %c0_i32_0 = arith.constant 0 : i32
    return %arg0, %c0_i32, %arg1 : i32, i32, i32
  }
  func.func @transform_1(%arg0: i32, %arg1: i32, %arg2: memref<2xi32, #tpu.memory_space<smem>>) -> (i32, i32, i32) {
    %c0_i32 = arith.constant 0 : i32
    %c0_i32_0 = arith.constant 0 : i32
    return %arg0, %c0_i32, %arg1 : i32, i32, i32
  }
  func.func @transform_2(%arg0: i32, %arg1: i32, %arg2: memref<2xi32, #tpu.memory_space<smem>>) -> (i32, i32, i32) {
    %c0_i32 = arith.constant 0 : i32
    %c0_i32_0 = arith.constant 0 : i32
    %c0_i32_1 = arith.constant 0 : i32
    return %arg0, %c0_i32, %c0_i32_0 : i32, i32, i32
  }
}

</mosaic_0001>

<bundles_post_ra>
// kernel: tpu_custom_call.1
= control target key start
LH: loop header
LB: loop body
LE: loop exit
PB: predicated region body
PF: predicated region fallthrough
CT: control target
= control target key end

     0   :  { %s988_s0 = inlined_call_operand.hbm [shape: s32[2], index: 0, kind: input, shape index: {}]   ;;  %s989_s1 = inlined_call_operand.hbm [shape: f32[2,4,256], index: 1, kind: input, shape index: {}]   ;;  %s990_s2 = inlined_call_operand.vmem [shape: s32[2,1,256], index: 2, kind: input, shape index: {}]   ;;  %s991_s3 = inlined_call_operand.hbm [shape: f32[2,2,128], index: 3, kind: output, shape index: {}]  }
   0x1   :  { %s611_s14 = scalar_lea.hbm %s988_s0, 16 }
   0x2   :  { %p612_p0 = scmp.ne.s32.totalorder %s988_s0, %s611_s14  ;;  %p615_p1 = scmp.lt.u32.totalorder %s611_s14, %s988_s0 }
   0x4   :  { %p617_p2 = pnand %p615_p1, %p612_p0 }
   0x6   :  { %620 = shalt.err (!%p617_p2)  }
   0x7   :  { %s737_s19 = smov [#allocation5]  }
   0x8   :  { %9 = dma.hbm_to_smem %s988_s0, 16, %s737_s19, [#allocation4] }
   0x9   :  { %703 = dma.done.wait [#allocation4], 16 }
   0xa   :  { %704 = vsyncadd [#allocation4], 4294967280 }
   0xb   :  { %11 = sfence }
   0xc   :  { %12 = vsyncpa [#allocation7], 0 }
   0xd   :  { %14 = vsyncpa [#allocation7 + $0x1], 0 }
   0xe   :  { %15 = vsyncpa [#allocation8], 0 }
   0xf   :  { %17 = vsyncpa [#allocation8 + $0x1], 0  ;;  %s774_s22 = smov 0   ;;  %s776_s23 = smov 0  }
  0x10   :  { %s778_s24 = smov 0   ;;  %s780_s25 = smov 0  }
  0x11   :  { %s782_s26 = smov 0   ;;  %s784_s27 = smov 0  }
  0x12 LB: > { %s517_s0 = sadd.s32 4294967295, %s735_s27   ;;  %s518_s28 = sadd.s32 4294967294, %s735_s27   ;;  %s735_s27 = sphi %s784_s27, %s23_s27   ;;  %s731_s26 = sphi %s782_s26, %s1009_s26   ;;  %s727_s25 = sphi %s780_s25, %s1008_s25   ;;  %s723_s24 = sphi %s778_s24, %s1007_s24   ;;  %s719_s23 = sphi %s776_s23, %s1006_s23   ;;  %s715_s22 = sphi %s774_s22, %s1005_s22  }
  0x13   : > { %s35_s29 = sadd.s32 1, %s731_s26  ;;  %s44_s30 = sadd.s32 1, %s723_s24 }
  0x14   : > { %p37_p3 = scmp.ge.s32.totalorder %s35_s29, 2  ;;  %p51_p4 = scmp.ne.s32.totalorder %s723_s24, %s719_s23 }
  0x15   : > { %p52_p5 = scmp.eq.s32.totalorder %s735_s27, 0  ;;  %p57_p6 = scmp.ne.s32.totalorder %s719_s23, %s715_s22 }
  0x16   : > { %s1011_s29 = smov (%p37_p3, %s35_s29), 0  ;;  %p58_p8 = scmp.eq.s32.totalorder %s517_s0, 0 }
  0x17   : > { %p815_p7 = por %p52_p5, %p51_p4  ;;  %s39_s5 = ssub.s32 %s731_s26, %s1011_s29 }
  0x18   : > { %p109_p9 = scmp.eq.s32.totalorder %s517_s0, 1  ;;  %p42_p10 = scmp.eq.s32.totalorder %s39_s5, 0 }
  0x19   : > { %p821_p11 = por %p58_p8, %p57_p6  ;;  %p115_p13 = scmp.eq.s32.totalorder %s518_s28, 1 }
  0x1a   : > { %p825_p12 = por %p109_p9, %p51_p4  ;;  %p551_p2 = scmp.lt.s32.totalorder %s735_s27, 2 }
  0x1b   : > { %s830_s8 = scalar_select %p42_p10, %s723_s24, %s44_s30  }
  0x1c   : > { %s995_s7 = scalar_select %p825_p12, 1, 0 }
  0x1d   : > { %p832_p0 = por %p115_p13, %p57_p6  ;;  %s135_s10 = sand.u32 1, %s723_s24  }
  0x1e   : > { %s521_s11 = sshll.u32 %s135_s10, 3  ;;  %s534_s12 = sshll.u32 %s731_s26, 7 }
  0x1f   : > { %s996_s9 = scalar_select %p832_p0, 1, 0 }
  0x20   : > { %s843_s15 = scalar_lea.hbm %s989_s1, %s534_s12  ;;  %s139_s16 = scalar_lea.vmem [#allocation6], %s521_s11 }
  0x21   : > { %s149_s17 = sshll.u32 %s139_s16, 4  ;;  %p849_p3 = pnand %p551_p2, %p815_p7  ;;  %s845_s17 = int_to_ptr.vmem [resolvable:$true] %s149_s17 }
  0x22   : > { %s136_s19 = scalar_lea.sflag [#allocation7], %s135_s10  ;;  %s621_s20 = scalar_lea.hbm %s843_s15, 128 }
  0x23   : > { %p622_p6 = scmp.ne.s32.totalorder %s843_s15, %s621_s20  ;;  %p623_p8 = pneg %p849_p3 }
  0x24   : > { %s626_s28 = scalar_lea.hbm %s989_s1, 256  ;;  %p627_p7 = scmp.lt.u32.totalorder %s843_s15, %s989_s1 }
  0x25   : > { %p624_p9 = pnand %p623_p8, %p622_p6  ;;  %p628_p13 = scmp.lt.u32.totalorder %s626_s28, %s621_s20 }
  0x26   : > { %p630_p1 = scmp.lt.u32.totalorder %s621_s20, %s843_s15 }
  0x27   : > { %p625_p10 = pneg %p624_p9  ;;  %p629_p2 = por %p628_p13, %p627_p7 }
  0x29   : > { %p631_p4 = por %p630_p1, %p629_p2 }
  0x2b   : > { %p632_p5 = pnand %p631_p4, %p625_p10 }
  0x2d   : > { %635 = shalt.err (!%p632_p5)
}
  0x2e   : > { %s636_s5 = scalar_lea.vmem %s845_s17, 128  ;;  %s738_s10 = smov [#allocation6]  }
  0x2f   : > { %p637_p6 = scmp.ne.s32.totalorder %s845_s17, %s636_s5  ;;  %s641_s11 = sshll.u32 %s738_s10, 4  ;;  %s642_s11 = int_to_ptr.vmem [resolvable:$false] %s641_s11 }
  0x30   : > { %s643_s12 = scalar_lea.vmem %s642_s11, 256  ;;  %p644_p12 = scmp.lt.s32.totalorder %s845_s17, %s642_s11 }
  0x31   : > { %p639_p9 = pnand %p637_p6, %p623_p8  ;;  %p645_p7 = scmp.lt.s32.totalorder %s643_s12, %s636_s5 }
  0x33   : > { %p640_p0 = pneg %p639_p9  ;;  %p646_p13 = por %p645_p7, %p644_p12 }
  0x35   : > { %p647_p1 = pnand %p646_p13, %p640_p0 }
  0x37   : > { %650 = shalt.err (!%p647_p1)
}
  0x38   : > { %546 = dma.hbm_to_vmem [thread:$0]  (!%p849_p3), %s843_s15, 128, %s845_s17, %s136_s19  }
  0x39   : > { %p998_p4 = scmp.lt.s32.totalorder %s735_s27, 3  ;;  %p999_p5 = scmp.ge.s32.totalorder %s735_s27, 1 }
  0x3b   : > { %p167_p8 = pnand %p999_p5, %p998_p4 }
  0x3c   : > { %s885_s13 = sand.u32 (!%p167_p8), 1, %s719_s23  }
  0x3d   : > { %170 = sbr.rel (%p167_p8) target bundleno = 381 (0x17d), region = 28  ;;  %s525_s14 = sshll.u32 (!%p167_p8), %s885_s13, 3 }
  0x3e   : > { %s173_s16 = scalar_lea.sflag (!%p167_p8), [#allocation7], %s885_s13  ;;  %s176_s20 = scalar_lea.vmem (!%p167_p8), [#allocation6], %s525_s14 }
  0x44   : > { %706 = dma.done.wait (%p821_p11), %s173_s16, 128  }
  0x45   : > { %708 = vsyncadd (%p821_p11), %s173_s16, 4294967168  ;;  %p207_p12 = scmp.lt.s32.totalorder %s727_s25, 1  ;;  %v219_v0 = vlaneseq  ;;  %s227_s15 = sld [smem:[#allocation5]]  ;;  %v739_v2 = vmov 0.0   ;;  %vm240_vm1 = vcmask 1043456   ;;  %v225_v3 = vld [vmem:[%s176_s20] sm:$0xff] }
  0x46   : > { %s528_s6 = sld [smem:[#allocation5 + $0x1]]  ;;  %v238_v5 = vcombine.high %v225_v3, %v225_v3  ;;  %v241_v6 = vsel %vm240_vm1, %v225_v3, -inf  ;;  %vm365_vm10 = vcmask 1040384   ;;  %s526_s30 = sshll.u32 %s885_s13, 1 }
  0x47   : > { %s208_s17 = scalar_select %p207_p12, %s727_s25, 1  ;;  %vm895_vm0 = vcmp.lt.s32.totalorder %v219_v0, 256  ;;  %v242_v7 = vrot.slane %v241_v6, 4  ;;  %v910_v28 = vshrl.u32 %v219_v0, 7 }
  0x48   : > { %223 = vst.msk [vmem:[#allocation2] sm:$0x3] %vm895_vm0, %v739_v2  ;;  %224 = vst.msk [vmem:[#allocation3] sm:$0x3] %vm895_vm0, %v739_v2  ;;  %v248_v8 = vsel %vm240_vm1, %v238_v5, -inf  ;;  %s531_s4 = sshll.u32 %s727_s25, 5 }
  0x49   : > { %s527_s18 = sshll.u32 %s208_s17, 1  ;;  %v243_v10 = vmax.f32 %v241_v6, %v242_v7  ;;  %v249_v11 = vrot.slane %v248_v8, 4  ;;  %v913_v30 = vsub.s32 0, %v910_v28  ;;  %v916_v31 = vsub.s32 1, %v910_v28  ;;  %s204_s10 = scalar_lea.vmem [#allocation9], %s526_s30 }
  0x4a   : > { %s213_s0 = scalar_lea.vmem %s990_s2, %s527_s18  ;;  %s421_s11 = sshll.u32 %s204_s10, 4  ;;  %vm402_vm11 = vcmp.eq.s32.totalorder %v910_v28, 0  ;;  %s941_s11 = int_to_ptr.vmem [resolvable:$true] %s421_s11 }
  0x4b   : > { %v226_v4 = vld [vmem:[%s213_s0] sm:$0x3]  ;;  %p229_p11 = scmp.eq.s32.totalorder %s227_s15, 1  ;;  %v244_v13 = vrot.slane %v243_v10, 2  ;;  %v250_v14 = vmax.f32 %v248_v8, %v249_v11  ;;  %s939_s20 = scalar_lea.hbm %s991_s3, %s531_s4 }
  0x4c   : > { %vm230_vm2 = vcmp.eq.s32.totalorder %v226_v4, 255  ;;  %v235_v12 = vstv %s528_s6  ;;  %s408_s25 = scalar_lea.sflag [#allocation8], %s885_s13  ;;  %s651_s15 = scalar_lea.vmem %s941_s11, 32 }
  0x4d   : > { %s231_s28 = scalar_select %p229_p11, 1, 0  ;;  %v245_v16 = vmax.f32 %v243_v10, %v244_v13  ;;  %v251_v17 = vrot.slane %v250_v14, 2 }
  0x4e   : > { %p652_p0 = scmp.ne.s32.totalorder %s941_s11, %s651_s15  ;;  %p1002_p3 = scmp.ne.s32.totalorder %s995_s7, 0 }
  0x4f   : > { %v232_v9 = vstv %s231_s28  ;;  %v347_v18 = vld [vmem:[#allocation3] sm:$0x3]  ;;  %v246_v19 = vrot.slane %v245_v16, 1  ;;  %v252_v20 = vmax.f32 %v250_v14, %v251_v17  ;;  %s741_s17 = smov [#allocation9]  }
  0x50   : > { %vm233_vm3 = vcmp.eq.s32.totalorder %v232_v9, 1  ;;  %p653_p10 = pnand %p652_p0, %p1002_p3  ;;  %s655_s18 = sshll.u32 %s741_s17, 4  ;;  %s656_s18 = int_to_ptr.vmem [resolvable:$false] %s655_s18 }
  0x51   : > { %vm234_vm4 = vmand %vm233_vm3, %vm230_vm2  ;;  %v247_v22 = vmax.f32 %v245_v16, %v246_v19  ;;  %v253_v23 = vrot.slane %v252_v20, 1  ;;  %v322_v19 = vld [vmem:[#allocation2] sm:$0x3]  ;;  %s657_s6 = scalar_lea.vmem %s656_s18, 64  ;;  %p658_p6 = scmp.lt.s32.totalorder %s941_s11, %s656_s18 }
  0x52   : > { %v236_v15 = vsel %vm234_vm4, %v235_v12, %v226_v4  ;;  %p654_p2 = pneg %p653_p10  ;;  %p659_p9 = scmp.lt.s32.totalorder %s657_s6, %s651_s15 }
  0x53   : > { %vm317_vm5 = vcmp.ge.s32.totalorder %v236_v15, 0  ;;  %vm318_vm6 = vcmp.lt.s32.totalorder %v236_v15, 4  ;;  %v254_v25 = vmax.f32 %v252_v20, %v253_v23  ;;  %v292_v32 = vrot.slane %v236_v15, %v913_v30 }
  0x54   : > { %vm319_vm7 = vmand %vm317_vm5, %vm318_vm6  ;;  %v296_v33 = vrot.slane %v236_v15, %v916_v31  ;;  %p660_p7 = por %p659_p9, %p658_p6 }
  0x55   : > { %v529_v21 = vsel %vm319_vm7, 1.0, %v739_v2  ;;  %v257_v26 = vcombine.low %v247_v22, %v254_v25  ;;  %vm297_vm8 = vcmp.eq.s32.totalorder %v910_v28, %v292_v32 }
  0x56   : > { %v348_v24 = vadd.f32 %v529_v21, %v347_v18  ;;  %vm298_vm9 = vcmp.eq.s32.totalorder %v910_v28, %v296_v33  ;;  %p661_p13 = pnand %p660_p7, %p654_p2 }
  0x57   : > { %v259_v27 = vsub.f32 %v225_v3, %v257_v26  ;;  %v740_v3 = vmov 1966171168  }
  0x58   : > { %349 = vst.msk [vmem:[#allocation3] sm:$0x3] %vm895_vm0, %v348_v24  ;;  %v327_v4 = vunpack.c.l.s4 %v740_v3 }
  0x59   : > { %v260_v29 = vmul.f32 1.442695, %v259_v27 }
  0x5a   : > { %v328_v12 = vunpack.c.0.s8 %v327_v4 }
  0x5b   : > { %605 = vpow2.f32 %v260_v29 }
  0x5c   : > { %v331_v16 = vsub.s32 %v328_v12, %v910_v28 }
  0x5f   : > { %v378_v22 = vld [vmem:[#allocation3] sm:$0x3] }
  0x60   : > { %v383_v23 = vrot.slane %v378_v22, %v913_v30  ;;  %v387_v24 = vrot.slane %v378_v22, %v916_v31 }
  0x62   : > { %v390_v33 = vsel %vm365_vm10, %v383_v23, 0.0 }
  0x65   : > { %v606_v34 = vpop.eup %605 }
  0x66   : > { %v263_v35 = vcombine.high %v606_v34, %v606_v34  ;;  %v265_v36 = vsel %vm240_vm1, %v606_v34, 0.0  ;;  %v299_v37 = vsel %vm297_vm8, %v606_v34, 0.0  ;;  %v391_v34 = vsel %vm365_vm10, %v387_v24, 0.0 }
  0x67   : > { %v266_v38 = vrot.slane %v265_v36, 4  ;;  %v301_v43 = vsel %vm240_vm1, %v299_v37, 0.0 }
  0x68   : > { %v272_v39 = vsel %vm240_vm1, %v263_v35, 0.0  ;;  %v300_v40 = vsel %vm298_vm9, %v263_v35, 0.0  ;;  %v302_v47 = vrot.slane %v301_v43, 4 }
  0x69   : > { %v267_v41 = vadd.f32 %v266_v38, %v265_v36  ;;  %v273_v42 = vrot.slane %v272_v39, 4  ;;  %v308_v46 = vsel %vm240_vm1, %v300_v40, 0.0  ;;  %v392_v36 = vadd.f32 %v391_v34, %v390_v33 }
  0x6a   : > { %v309_v50 = vrot.slane %v308_v46, 4  ;;  %v303_v53 = vadd.f32 %v302_v47, %v301_v43 }
  0x6b   : > { %v268_v44 = vrot.slane %v267_v41, 2  ;;  %v274_v45 = vadd.f32 %v273_v42, %v272_v39 }
  0x6c   : > { %v310_v56 = vadd.f32 %v309_v50, %v308_v46  ;;  %v304_v58 = vrot.slane %v303_v53, 2 }
  0x6d   : > { %v269_v48 = vadd.f32 %v268_v44, %v267_v41  ;;  %v275_v49 = vrot.slane %v274_v45, 2 }
  0x6e   : > { %v311_v59 = vrot.slane %v310_v56, 2  ;;  %v305_v60 = vadd.f32 %v304_v58, %v303_v53 }
  0x6f   : > { %v270_v51 = vrot.slane %v269_v48, 1  ;;  %v276_v52 = vadd.f32 %v275_v49, %v274_v45 }
  0x70   : > { %v312_v61 = vadd.f32 %v311_v59, %v310_v56  ;;  %v306_v62 = vrot.slane %v305_v60, 1 }
  0x71   : > { %v271_v54 = vadd.f32 %v270_v51, %v269_v48  ;;  %v277_v55 = vrot.slane %v276_v52, 1 }
  0x72   : > { %v313_v2 = vrot.slane %v312_v61, 1  ;;  %v307_v8 = vadd.f32 %v306_v62, %v305_v60 }
  0x73   : > { %v278_v57 = vadd.f32 %v277_v55, %v276_v52  ;;  %607 = vrcp.f32 %v271_v54 }
  0x74   : > { %v314_v11 = vadd.f32 %v313_v2, %v312_v61 }
  0x75   : > { %609 = vrcp.f32 %v278_v57 }
  0x7d   : > { %v608_v63 = vpop.eup %607 }
  0x7e   : > { %v281_v0 = vmul.f32 %v608_v63, %v271_v54 }
  0x7f   : > { %v610_v5 = vpop.eup %609 }
  0x80   : > { %v282_v6 = vmul.f32 %v610_v5, %v278_v57  ;;  %v283_v7 = vsub.f32 2.0, %v281_v0 }
  0x82   : > { %v284_v9 = vsub.f32 2.0, %v282_v6  ;;  %v285_v10 = vmul.f32 %v608_v63, %v283_v7 }
  0x84   : > { %v286_v13 = vmul.f32 %v610_v5, %v284_v9  ;;  %v315_v14 = vmul.f32 %v307_v8, %v285_v10 }
  0x86   : > { %v316_v15 = vmul.f32 %v314_v11, %v286_v13 }
  0x88   : > { %v325_v17 = vcombine.low %v315_v14, %v316_v15 }
  0x8a   : > { %v332_v18 = vrot.slane %v325_v17, %v331_v16 }
  0x8c   : > { %v339_v20 = vrot.slane %v332_v18, %v331_v16 }
  0x8e   : > { %v341_v21 = vadd.f32 %v339_v20, %v322_v19 }
  0x90   : > { %346 = vst.msk [vmem:[#allocation2] sm:$0x3] %vm895_vm0, %v341_v21 }
  0x97   : > { %v353_v25 = vld [vmem:[#allocation2] sm:$0x3] }
  0x98   : > { %v358_v26 = vrot.slane %v353_v25, %v913_v30  ;;  %v362_v27 = vrot.slane %v353_v25, %v916_v31 }
  0x9a   : > { %v366_v29 = vsel %vm365_vm10, %v358_v26, 0.0  ;;  %v367_v32 = vsel %vm365_vm10, %v362_v27, 0.0 }
  0x9b   : > { %v368_v35 = vadd.f32 %v367_v32, %v366_v29 }
  0x9d   : > { %369 = vadd.xlane.f32.xlu0 %v368_v35 }
  0xa1   : > { %393 = vadd.xlane.f32.xlu0 %v392_v36 }
 0x12a   : > { %v370_v1 = vpop.xlane.xlu0 %369 }
 0x12b   : > { %v371_v37 = vrot.slane %v370_v1, 4 }
 0x12d   : > { %v372_v38 = vadd.f32 %v371_v37, %v370_v1 }
 0x12e   : > { %v394_v39 = vpop.xlane.xlu0 %393 }
 0x12f   : > { %v373_v40 = vrot.slane %v372_v38, 2  ;;  %v395_v41 = vrot.slane %v394_v39, 4 }
 0x131   : > { %v396_v42 = vadd.f32 %v395_v41, %v394_v39  ;;  %v374_v30 = vadd.f32 %v373_v40, %v372_v38 }
 0x133   : > { %v397_v43 = vrot.slane %v396_v42, 2  ;;  %v375_v31 = vrot.slane %v374_v30, 1 }
 0x135   : > { %v398_v44 = vadd.f32 %v397_v43, %v396_v42  ;;  %v376_v45 = vadd.f32 %v375_v31, %v374_v30 }
 0x137   : > { %535 = vpush %v376_v45  ;;  %v399_v46 = vrot.slane %v398_v44, 1 }
 0x139   : > { %v400_v47 = vadd.f32 %v399_v46, %v398_v44 }
 0x13b   : > { %537 = vpush %v400_v47 }
 0x168   : > { %s536_s5 = spop %535 }
 0x169   : > { %v403_v48 = vstv %s536_s5 }
 0x16c   : > { %s538_s12 = spop %537 }
 0x16d   : > { %v404_v49 = vstv %s538_s12 }
 0x16e   : > { %v405_v50 = vsel %vm402_vm11, %v403_v48, %v404_v49 }
 0x16f   : > { %406 = vst [vmem:[%s204_s10] sm:$0x3] %v405_v50 }
 0x170   : > { %664 = shalt.err (!%p661_p13)
}
 0x171   : > { %s665_s13 = scalar_lea.hbm %s939_s20, 32  ;;  %s669_s0 = scalar_lea.hbm %s991_s3, 64 }
 0x172   : > { %p666_p1 = scmp.ne.s32.totalorder %s939_s20, %s665_s13  ;;  %p670_p8 = scmp.lt.u32.totalorder %s939_s20, %s991_s3 }
 0x173   : > { %p671_p12 = scmp.lt.u32.totalorder %s669_s0, %s665_s13  ;;  %p673_p0 = scmp.lt.u32.totalorder %s665_s13, %s939_s20 }
 0x174   : > { %p667_p4 = pnand %p666_p1, %p1002_p3 }
 0x175   : > { %p672_p11 = por %p671_p12, %p670_p8 }
 0x176   : > { %p668_p5 = pneg %p667_p4 }
 0x177   : > { %p674_p10 = por %p673_p0, %p672_p11 }
 0x179   : > { %p675_p2 = pnand %p674_p10, %p668_p5 }
 0x17b   : > { %678 = shalt.err (!%p675_p2)
}
 0x17c   : > { %541 = dma.vmem_to_hbm [thread:$0]  (%p1002_p3), %s941_s11, 32, %s939_s20, %s408_s25  }
 0x17d PF: > { %s433_s4 = sand.u32 1, %s715_s22   ;;  %p1003_p6 = scmp.ne.s32.totalorder %s996_s9, 0 }
 0x17e   : > { %p1004_p9 = scmp.ge.s32.totalorder %s735_s27, 2  ;;  %s434_s5 = scalar_lea.sflag [#allocation8], %s433_s4 }
 0x180   : > { %p548_p7 = pnand %p1004_p9, %p1003_p6 }
 0x182   : > { %710 = dma.done.wait (!%p548_p7), %s434_s5, 32  }
 0x183   : > { %712 = vsyncadd (!%p548_p7), %s434_s5, 4294967264  ;;  %s23_s27 = sadd.s32 1, %s735_s27   ;;  %s1005_s22 = smov %s719_s23 }
 0x184   : > { %p20_p13 = scmp.ge.s32.totalorder %s23_s27, 4   ;;  %s1006_s23 = smov %s723_s24 }
 0x185   : > { %s1007_s24 = smov %s830_s8  ;;  %s1008_s25 = smov %s731_s26 }
 0x186   : > { %s1009_s26 = smov %s1011_s29  ;;  %22 = sbr.rel (!%p20_p13) target bundleno = 18 (0x12), region = 84 }
 0x18d   :  { %439 = vsyncpa [#allocation7], 1 }
 0x18e   :  { %441 = vsyncpa [#allocation7 + $0x1], 1 }
 0x18f   :  { %442 = vsyncpa [#allocation8], 1 }
 0x190   :  { %444 = vsyncpa [#allocation8 + $0x1], 1 }

</bundles_post_ra>
